<compile_context>
chip_gen: v7x
topology: tpu7x:2x2x1
jax: 0.10.0
libtpu: 0.0.40
codegen_flags: <defaults>
</compile_context>

<pallas_src>
import math

import jax
import jax.numpy as jnp
from jax.experimental import pallas as pl
from jax.experimental.pallas import tpu as pltpu

d_k = d_v = 8


def _sdpa_kernel(q_ref, k_ref, v_ref, mask_ref, ctx_ref, attn_ref):
    # q_ref: (G, Sq, Dk), k_ref: (G, Sk, Dk), v_ref: (G, Sk, Dv)
    # mask_ref: (G, Sq, Sk) int8 (nonzero => masked)
    inv_sqrt_dk = jnp.asarray(1.0 / math.sqrt(d_k), dtype=q_ref.dtype)
    q = q_ref[...] * inv_sqrt_dk          # fold scale into Q (small tensor)
    k = k_ref[...]
    v = v_ref[...]

    # scores = (Q / sqrt(d_k)) @ K^T, batched over the packed-head axis.
    scores = jnp.einsum("gqd,gkd->gqk", q, k,
                        preferred_element_type=jnp.float32)

    # masked_fill_(attn_mask, -1e9)
    scores = jnp.where(mask_ref[...] != 0, jnp.float32(-1e9), scores)

    # numerically stable softmax over the last dim (matches torch)
    m = jnp.max(scores, axis=-1, keepdims=True)
    e = jnp.exp(scores - m)
    denom = jnp.sum(e, axis=-1, keepdims=True)
    attn = e * pl.reciprocal(denom, approx=False)

    # context = attn @ V, batched over the packed-head axis.
    ctx = jnp.einsum("gqk,gkd->gqd", attn.astype(v.dtype), v,
                     preferred_element_type=jnp.float32)

    ctx_ref[...] = ctx.astype(ctx_ref.dtype)
    attn_ref[...] = attn.astype(attn_ref.dtype)


def scaled_dot_product_attention(Q, K, V, attn_mask, *, input_dtype=None):
    """Q: [B,H,Sq,Dk], K: [B,H,Sk,Dk], V: [B,H,Sk,Dv], attn_mask: [B,H,Sq,Sk] bool.

    input_dtype: optional dtype (e.g. jnp.bfloat16) for the Q/K/V matmul
    streams on v6e/v7x. Defaults to float32 (exact module numerics).
    """
    B, H, Sq, Dk = Q.shape
    Sk = K.shape[2]
    Dv = V.shape[3]
    BH = B * H

    compute_dtype = jnp.float32 if input_dtype is None else input_dtype
    q = Q.reshape(BH, Sq, Dk).astype(compute_dtype)
    k = K.reshape(BH, Sk, Dk).astype(compute_dtype)
    v = V.reshape(BH, Sk, Dv).astype(compute_dtype)
    mask = attn_mask.reshape(BH, Sq, Sk).astype(jnp.int8)

    # 2 parallel steps when possible (keeps both v7x TensorCores busy); a
    # single step otherwise.  Either way the per-step block carries many heads.
    num_blocks = 2 if (BH >= 2 and BH % 2 == 0) else 1
    G = BH // num_blocks

    grid_spec = pltpu.PrefetchScalarGridSpec(
        num_scalar_prefetch=0,
        grid=(num_blocks,),
        in_specs=[
            pl.BlockSpec((G, Sq, Dk), lambda i: (i, 0, 0)),
            pl.BlockSpec((G, Sk, Dk), lambda i: (i, 0, 0)),
            pl.BlockSpec((G, Sk, Dv), lambda i: (i, 0, 0)),
            pl.BlockSpec((G, Sq, Sk), lambda i: (i, 0, 0)),
        ],
        out_specs=[
            pl.BlockSpec((G, Sq, Dv), lambda i: (i, 0, 0)),
            pl.BlockSpec((G, Sq, Sk), lambda i: (i, 0, 0)),
        ],
    )

    ctx, attn = pl.pallas_call(
        _sdpa_kernel,
        grid_spec=grid_spec,
        out_shape=(
            jax.ShapeDtypeStruct((BH, Sq, Dv), jnp.float32),
            jax.ShapeDtypeStruct((BH, Sq, Sk), jnp.float32),
        ),
        compiler_params=pltpu.CompilerParams(
            dimension_semantics=("parallel",)
        ),
    )(q, k, v, mask)

    return ctx.reshape(B, H, Sq, Dv), attn.reshape(B, H, Sq, Sk)


def _reference(Q, K, V, attn_mask):
    scores = jnp.einsum("bhqd,bhkd->bhqk", Q, K) / math.sqrt(d_k)
    scores = jnp.where(attn_mask, -1e9, scores)
    attn = jax.nn.softmax(scores, axis=-1)
    ctx = jnp.einsum("bhqk,bhkd->bhqd", attn, V)
    return ctx, attn


if __name__ == "__main__":
    key = jax.random.PRNGKey(0)
    B, H, S = 2, 2, 8  # small shapes; d_k = d_v = 8 per the module
    kq, kk, kv = jax.random.split(key, 3)

    Q = jax.random.normal(kq, (B, H, S, d_k), dtype=jnp.float32)
    K = jax.random.normal(kk, (B, H, S, d_k), dtype=jnp.float32)
    V = jax.random.normal(kv, (B, H, S, d_v), dtype=jnp.float32)
    # causal-style mask: mask out strictly-upper-triangular (future) positions
    attn_mask = jnp.triu(jnp.ones((S, S), dtype=bool), k=1)[None, None]
    attn_mask = jnp.broadcast_to(attn_mask, (B, H, S, S))

    ctx, attn = scaled_dot_product_attention(Q, K, V, attn_mask)
    jax.block_until_ready((ctx, attn))

    ctx_ref, attn_ref = _reference(Q, K, V, attn_mask)
    assert jnp.allclose(ctx, ctx_ref, atol=1e-4), "context mismatch"
    assert jnp.allclose(attn, attn_ref, atol=1e-5), "attn mismatch"

    print("KERNEL_OK")
</pallas_src>

<mosaic_0001>
module attributes {stable_mosaic.version = 11 : i64} {
  func.func @_sdpa_kernel(%arg0: i32, %arg1: memref<2x8x8xf32, #tpu.memory_space<vmem>>, %arg2: memref<2x8x8xf32, #tpu.memory_space<vmem>>, %arg3: memref<2x8x8xf32, #tpu.memory_space<vmem>>, %arg4: memref<2x8x8xi8, #tpu.memory_space<vmem>>, %arg5: memref<2x8x8xf32, #tpu.memory_space<vmem>>, %arg6: memref<2x8x8xf32, #tpu.memory_space<vmem>>) attributes {dimension_semantics = [#tpu.dimension_semantics<parallel>], iteration_bounds = array<i64: 2>, scalar_prefetch = 0 : i64, scratch_operands = 0 : i64, tpu.core_type = #tpu.core_type<tc>, window_params = [{transform_indices = @transform_0, window_bounds = array<i64: 2, 8, 8>}, {transform_indices = @transform_1, window_bounds = array<i64: 2, 8, 8>}, {transform_indices = @transform_2, window_bounds = array<i64: 2, 8, 8>}, {transform_indices = @transform_3, window_bounds = array<i64: 2, 8, 8>}, {transform_indices = @transform_4, window_bounds = array<i64: 2, 8, 8>}, {transform_indices = @transform_5, window_bounds = array<i64: 2, 8, 8>}]} {
    %c0 = arith.constant 0 : index
    %c0_0 = arith.constant 0 : index
    %c0_1 = arith.constant 0 : index
    %0 = vector.load %arg1[%c0, %c0_0, %c0_1] : memref<2x8x8xf32, #tpu.memory_space<vmem>>, vector<2x8x8xf32>
    %cst = arith.constant 0.353553385 : f32
    %1 = vector.broadcast %cst : f32 to vector<2x8x8xf32>
    %2 = arith.mulf %0, %1 : vector<2x8x8xf32>
    %c0_2 = arith.constant 0 : index
    %c0_3 = arith.constant 0 : index
    %c0_4 = arith.constant 0 : index
    %3 = vector.load %arg2[%c0_2, %c0_3, %c0_4] : memref<2x8x8xf32, #tpu.memory_space<vmem>>, vector<2x8x8xf32>
    %c0_5 = arith.constant 0 : index
    %c0_6 = arith.constant 0 : index
    %c0_7 = arith.constant 0 : index
    %4 = vector.load %arg3[%c0_5, %c0_6, %c0_7] : memref<2x8x8xf32, #tpu.memory_space<vmem>>, vector<2x8x8xf32>
    "tpu.trace_start"() <{level = 10 : i32, message = "gqd,gkd->gqk"}> : () -> ()
    %cst_8 = arith.constant dense<0.000000e+00> : vector<2x8x8xf32>
    %5 = tpu.matmul %2, %3, %cst_8 {dimension_numbers = #tpu.dot_dimension_numbers<[2], [2], [1], [1], [0, 0, 0, 1, 1, 1], [0], [0]>} : vector<2x8x8xf32>, vector<2x8x8xf32>, vector<2x8x8xf32> -> vector<2x8x8xf32>
    "tpu.trace_stop"() : () -> ()
    %c0_9 = arith.constant 0 : index
    %c0_10 = arith.constant 0 : index
    %c0_11 = arith.constant 0 : index
    %6 = vector.load %arg4[%c0_9, %c0_10, %c0_11] : memref<2x8x8xi8, #tpu.memory_space<vmem>>, vector<2x8x8xi8>
    %c0_i8 = arith.constant 0 : i8
    %7 = vector.broadcast %c0_i8 : i8 to vector<2x8x8xi8>
    %8 = arith.cmpi ne, %6, %7 : vector<2x8x8xi8>
    %cst_12 = arith.constant -1.000000e+09 : f32
    %9 = vector.broadcast %cst_12 : f32 to vector<2x8x8xf32>
    %10 = arith.select %8, %9, %5 : vector<2x8x8xi1>, vector<2x8x8xf32>
    %cst_13 = arith.constant dense<0xFF800000> : vector<2x8xf32>
    %11 = vector.multi_reduction <maximumf>, %10, %cst_13 [2] : vector<2x8x8xf32> to vector<2x8xf32>
    %12 = vector.shape_cast %11 : vector<2x8xf32> to vector<2x8x1xf32>
    %13 = vector.broadcast %12 : vector<2x8x1xf32> to vector<2x8x8xf32>
    %14 = arith.subf %10, %13 : vector<2x8x8xf32>
    %15 = math.exp %14 : vector<2x8x8xf32>
    %cst_14 = arith.constant dense<0.000000e+00> : vector<2x8xf32>
    %16 = vector.multi_reduction <add>, %15, %cst_14 [2] : vector<2x8x8xf32> to vector<2x8xf32>
    %17 = vector.shape_cast %16 : vector<2x8xf32> to vector<2x8x1xf32>
    %18 = tpu.reciprocal %17 : vector<2x8x1xf32> -> vector<2x8x1xf32>
    %19 = vector.broadcast %18 : vector<2x8x1xf32> to vector<2x8x8xf32>
    %20 = arith.mulf %15, %19 : vector<2x8x8xf32>
    "tpu.trace_start"() <{level = 10 : i32, message = "gqk,gkd->gqd"}> : () -> ()
    %cst_15 = arith.constant dense<0.000000e+00> : vector<2x8x8xf32>
    %21 = tpu.matmul %20, %4, %cst_15 {dimension_numbers = #tpu.dot_dimension_numbers<[2], [1], [1], [2], [0, 0, 0, 1, 1, 2], [0], [0]>} : vector<2x8x8xf32>, vector<2x8x8xf32>, vector<2x8x8xf32> -> vector<2x8x8xf32>
    "tpu.trace_stop"() : () -> ()
    %c0_16 = arith.constant 0 : index
    %c0_17 = arith.constant 0 : index
    %c0_18 = arith.constant 0 : index
    %22 = vector.load %arg5[%c0_16, %c0_17, %c0_18] : memref<2x8x8xf32, #tpu.memory_space<vmem>>, vector<2x8x8xf32>
    tpu.vector_store %arg5[%c0_16, %c0_17, %c0_18], %21 {strides = array<i32>} : memref<2x8x8xf32, #tpu.memory_space<vmem>>, vector<2x8x8xf32>,
    %c0_19 = arith.constant 0 : index
    %c0_20 = arith.constant 0 : index
    %c0_21 = arith.constant 0 : index
    %23 = vector.load %arg6[%c0_19, %c0_20, %c0_21] : memref<2x8x8xf32, #tpu.memory_space<vmem>>, vector<2x8x8xf32>
    tpu.vector_store %arg6[%c0_19, %c0_20, %c0_21], %20 {strides = array<i32>} : memref<2x8x8xf32, #tpu.memory_space<vmem>>, vector<2x8x8xf32>,
    return
  }
  func.func @transform_0(%arg0: i32) -> (i32, i32, i32) {
    %c0_i32 = arith.constant 0 : i32
    %c0_i32_0 = arith.constant 0 : i32
    %c0_i32_1 = arith.constant 0 : i32
    return %arg0, %c0_i32, %c0_i32_0 : i32, i32, i32
  }
  func.func @transform_1(%arg0: i32) -> (i32, i32, i32) {
    %c0_i32 = arith.constant 0 : i32
    %c0_i32_0 = arith.constant 0 : i32
    %c0_i32_1 = arith.constant 0 : i32
    return %arg0, %c0_i32, %c0_i32_0 : i32, i32, i32
  }
  func.func @transform_2(%arg0: i32) -> (i32, i32, i32) {
    %c0_i32 = arith.constant 0 : i32
    %c0_i32_0 = arith.constant 0 : i32
    %c0_i32_1 = arith.constant 0 : i32
    return %arg0, %c0_i32, %c0_i32_0 : i32, i32, i32
  }
  func.func @transform_3(%arg0: i32) -> (i32, i32, i32) {
    %c0_i32 = arith.constant 0 : i32
    %c0_i32_0 = arith.constant 0 : i32
    %c0_i32_1 = arith.constant 0 : i32
    return %arg0, %c0_i32, %c0_i32_0 : i32, i32, i32
  }
  func.func @transform_4(%arg0: i32) -> (i32, i32, i32) {
    %c0_i32 = arith.constant 0 : i32
    %c0_i32_0 = arith.constant 0 : i32
    %c0_i32_1 = arith.constant 0 : i32
    return %arg0, %c0_i32, %c0_i32_0 : i32, i32, i32
  }
  func.func @transform_5(%arg0: i32) -> (i32, i32, i32) {
    %c0_i32 = arith.constant 0 : i32
    %c0_i32_0 = arith.constant 0 : i32
    %c0_i32_1 = arith.constant 0 : i32
    return %arg0, %c0_i32, %c0_i32_0 : i32, i32, i32
  }
}

</mosaic_0001>

<bundles_post_ra>
// kernel: tpu_custom_call.1
= control target key start
LH: loop header
LB: loop body
LE: loop exit
PB: predicated region body
PF: predicated region fallthrough
CT: control target
= control target key end

     0   :  { %s1604_s0 = inlined_call_operand.hbm [shape: f32[4,8,8], index: 0, kind: input, shape index: {}]   ;;  %s1605_s1 = inlined_call_operand.hbm [shape: f32[4,8,8], index: 1, kind: input, shape index: {}]   ;;  %s1606_s2 = inlined_call_operand.hbm [shape: f32[4,8,8], index: 2, kind: input, shape index: {}]   ;;  %s1607_s3 = inlined_call_operand.vmem [shape: s8[4,8,8], index: 3, kind: input, shape index: {}]   ;;  %s1608_s4 = inlined_call_operand.hbm [shape: f32[4,8,8], index: 4, kind: output, shape index: {0}]   ;;  %s1609_s5 = inlined_call_operand.hbm [shape: f32[4,8,8], index: 5, kind: output, shape index: {1}]  }
   0x1   :  { %1617 = sst [smem:[#allocation16_spill]] %s1604_s0 }
   0x2   :  { %1618 = sst [smem:[#allocation17_spill]] %s1605_s1 }
   0x3   :  { %11 = vsyncpa [#allocation3], 0 }
   0x4   :  { %13 = vsyncpa [#allocation3 + $0x1], 0 }
   0x5   :  { %14 = vsyncpa [#allocation6], 0 }
   0x6   :  { %16 = vsyncpa [#allocation6 + $0x1], 0 }
   0x7   :  { %17 = vsyncpa [#allocation4], 0 }
   0x8   :  { %19 = vsyncpa [#allocation4 + $0x1], 0 }
   0x9   :  { %20 = vsyncpa [#allocation10], 0 }
   0xa   :  { %22 = vsyncpa [#allocation10 + $0x1], 0  ;;  %s1279_s18 = smov 0   ;;  %s1281_s19 = smov 0  }
   0xb   :  { %s1283_s20 = smov 0   ;;  %s1285_s21 = smov 0  }
   0xc LB: > { %s1300_s22 = sadd.s32 4294967295, %s1235_s21   ;;  %s900_s23 = sadd.s32 4294967294, %s1235_s21   ;;  %s1235_s21 = sphi %s1285_s21, %s1641_s21   ;;  %s1231_s20 = sphi %s1283_s20, %s1640_s20   ;;  %s1227_s19 = sphi %s1281_s19, %s1639_s19   ;;  %s1223_s18 = sphi %s1279_s18, %s1638_s18  }
   0xd   : > { %s1304_s24 = sadd.s32 1, %s1235_s21   ;;  %s35_s25 = sadd.s32 1, %s1231_s20 }
   0xe   : > { %s32_s26 = ssub.s32 %s1235_s21, %s1304_s24  ;;  %p42_p0 = scmp.ne.s32.totalorder %s1231_s20, %s1227_s19 }
   0xf   : > { %p33_p1 = scmp.eq.s32.totalorder %s32_s26, 0  ;;  %p43_p2 = scmp.eq.s32.totalorder %s1235_s21, 0 }
  0x10   : > { %p48_p3 = scmp.ne.s32.totalorder %s1227_s19, %s1223_s18  ;;  %p49_p4 = scmp.eq.s32.totalorder %s1300_s22, 0 }
  0x11   : > { %s1316_s27 = scalar_select %p33_p1, %s1231_s20, %s35_s25  }
  0x12   : > { %p44_p5 = por %p43_p2, %p42_p0  ;;  %p1318_p6 = por %p49_p4, %p48_p3 }
  0x13   : > { %1619 = sst [smem:[#allocation15_spill]] %s1316_s27  ;;  %p150_p7 = scmp.eq.s32.totalorder %s1300_s22, 1 }
  0x14   : > { %s1620_s28 = scalar_select %p1318_p6, 1, 0 }
  0x15   : > { %p156_p8 = scmp.eq.s32.totalorder %s900_s23, 1  ;;  %p994_p10 = scmp.lt.s32.totalorder %s1235_s21, 2 }
  0x16   : > { %p1325_p11 = por %p150_p7, %p42_p0  ;;  %s1612_s6 = sand.u32 1, %s1231_s20  }
  0x17   : > { %p1329_p12 = por %p156_p8, %p48_p3  ;;  %s1335_s7 = sshll.u32 %s1235_s21, 8 }
  0x18   : > { %s1621_s29 = scalar_select %p1325_p11, 1, 0 }
  0x19   : > { %s1622_s30 = scalar_select %p1329_p12, 1, 0 }
  0x1a   : > { %s1339_s8 = sshll.u32 %s1612_s6, 4  ;;  %p1341_p13 = pnand %p994_p10, %p44_p5 }
  0x1b   : > { %s223_s10 = sand.u32 1, %s1235_s21   ;;  %s1624_s1 = sld [smem:[#allocation17_spill]] }
  0x1c   : > { %s227_s14 = scalar_lea.vmem [#allocation5], %s1339_s8  ;;  %s1356_s16 = scalar_lea.sflag [#allocation6], %s223_s10 }
  0x1d   : > { %s234_s15 = sshll.u32 %s227_s14, 4  ;;  %p1362_p2 = pneg %p1341_p13  ;;  %s1353_s15 = int_to_ptr.vmem [resolvable:$true] %s234_s15 }
  0x21   : > { %s1350_s13 = scalar_lea.hbm %s1624_s1, %s1335_s7  ;;  %s1048_s11 = scalar_lea.hbm %s1624_s1, 512 }
  0x22   : > { %s1043_s17 = scalar_lea.hbm %s1350_s13, 256  ;;  %p1049_p5 = scmp.lt.u32.totalorder %s1350_s13, %s1624_s1 }
  0x23   : > { %p1044_p1 = scmp.ne.s32.totalorder %s1350_s13, %s1043_s17  ;;  %p1050_p7 = scmp.lt.u32.totalorder %s1048_s11, %s1043_s17 }
  0x24   : > { %p1052_p10 = scmp.lt.u32.totalorder %s1043_s17, %s1350_s13 }
  0x25   : > { %p1046_p3 = pnand %p1362_p2, %p1044_p1  ;;  %p1051_p8 = por %p1050_p7, %p1049_p5 }
  0x27   : > { %p1047_p4 = pneg %p1046_p3  ;;  %p1053_p9 = por %p1052_p10, %p1051_p8 }
  0x29   : > { %p1054_p0 = pnand %p1053_p9, %p1047_p4 }
  0x2b   : > { %1057 = shalt.err (!%p1054_p0)
}
  0x2c   : > { %s1058_s10 = scalar_lea.vmem %s1353_s15, 256  ;;  %s1237_s25 = smov [#allocation5]  }
  0x2d   : > { %p1059_p1 = scmp.ne.s32.totalorder %s1353_s15, %s1058_s10  ;;  %s1063_s26 = sshll.u32 %s1237_s25, 4  ;;  %s1064_s26 = int_to_ptr.vmem [resolvable:$false] %s1063_s26 }
  0x2e   : > { %s1065_s12 = scalar_lea.vmem %s1064_s26, 512  ;;  %p1066_p11 = scmp.lt.s32.totalorder %s1353_s15, %s1064_s26 }
  0x2f   : > { %p1061_p3 = pnand %p1059_p1, %p1362_p2  ;;  %p1067_p6 = scmp.lt.s32.totalorder %s1065_s12, %s1058_s10 }
  0x31   : > { %p1062_p12 = pneg %p1061_p3  ;;  %p1068_p5 = por %p1067_p6, %p1066_p11 }
  0x33   : > { %p1069_p7 = pnand %p1068_p5, %p1062_p12 }
  0x35   : > { %1072 = shalt.err (!%p1069_p7)
}
  0x36   : > { %s1613_s17 = smov 128   ;;  %s1615_s11 = smov 8  }
  0x37   : > { %983 = dma.hbm_to_vmem [thread:$0]  (!%p1341_p13), %s1350_s13, 256, %s1353_s15, %s1356_s16, %s1613_s17, %s1613_s17, %s1615_s11  }
  0x38   : > { %p272_p6 = scmp.lt.s32.totalorder %s1235_s21, 3  ;;  %s1626_s0 = sld [smem:[#allocation16_spill]] }
  0x39   : > { %p1627_p9 = scmp.ge.s32.totalorder %s1235_s21, 1  ;;  %s206_s12 = scalar_lea.vmem [#allocation2], %s1339_s8 }
  0x3a   : > { %s213_s6 = sshll.u32 %s206_s12, 4  ;;  %s1629_s13 = sand.u32 1, %s1231_s20   ;;  %s1403_s6 = int_to_ptr.vmem [resolvable:$true] %s213_s6 }
  0x3b   : > { %p1398_p11 = pnand %p1627_p9, %p272_p6  ;;  %s1407_s15 = scalar_lea.sflag [#allocation3], %s1629_s13 }
  0x3d   : > { %s1628_s26 = scalar_select %p1398_p11, 1, 0 }
  0x3e   : > { %s1394_s25 = scalar_lea.hbm %s1626_s0, %s1335_s7  ;;  %s1078_s11 = scalar_lea.hbm %s1626_s0, 512 }
  0x3f   : > { %s1073_s17 = scalar_lea.hbm %s1394_s25, 256  ;;  %p1079_p8 = scmp.lt.u32.totalorder %s1394_s25, %s1626_s0 }
  0x40   : > { %p1074_p12 = scmp.ne.s32.totalorder %s1394_s25, %s1073_s17  ;;  %p1080_p10 = scmp.lt.u32.totalorder %s1078_s11, %s1073_s17 }
  0x41   : > { %p1082_p3 = scmp.lt.u32.totalorder %s1073_s17, %s1394_s25 }
  0x42   : > { %p1076_p0 = pnand %p1074_p12, %p1362_p2  ;;  %p1081_p1 = por %p1080_p10, %p1079_p8 }
  0x44   : > { %p1077_p4 = pneg %p1076_p0  ;;  %p1083_p5 = por %p1082_p3, %p1081_p1 }
  0x46   : > { %p1084_p7 = pnand %p1083_p5, %p1077_p4 }
  0x48   : > { %1087 = shalt.err (!%p1084_p7)
}
  0x49   : > { %s1088_s12 = scalar_lea.vmem %s1403_s6, 256  ;;  %s1240_s13 = smov [#allocation2]  }
  0x4a   : > { %p1089_p6 = scmp.ne.s32.totalorder %s1403_s6, %s1088_s12  ;;  %s1093_s14 = sshll.u32 %s1240_s13, 4  ;;  %s1094_s14 = int_to_ptr.vmem [resolvable:$false] %s1093_s14 }
  0x4b   : > { %s1095_s1 = scalar_lea.vmem %s1094_s14, 512  ;;  %p1096_p0 = scmp.lt.s32.totalorder %s1403_s6, %s1094_s14 }
  0x4c   : > { %p1091_p9 = pnand %p1089_p6, %p1362_p2  ;;  %p1097_p11 = scmp.lt.s32.totalorder %s1095_s1, %s1088_s12 }
  0x4e   : > { %p1092_p12 = pneg %p1091_p9  ;;  %p1098_p8 = por %p1097_p11, %p1096_p0 }
  0x50   : > { %p1099_p10 = pnand %p1098_p8, %p1092_p12 }
  0x52   : > { %1102 = shalt.err (!%p1099_p10)
}
  0x53   : > { %s1630_s27 = smov 8   ;;  %s1631_s17 = smov 128  }
  0x54   : > { %980 = dma.hbm_to_vmem [thread:$0]  (!%p1341_p13), %s1394_s25, 256, %s1403_s6, %s1407_s15, %s1631_s17, %s1631_s17, %s1630_s27  }
  0x55   : > { %s1438_s13 = scalar_lea.hbm %s1606_s2, %s1335_s7  ;;  %s248_s12 = scalar_lea.vmem [#allocation7], %s1339_s8 }
  0x56   : > { %s255_s14 = sshll.u32 %s248_s12, 4  ;;  %s1103_s1 = scalar_lea.hbm %s1438_s13, 256  ;;  %s1441_s14 = int_to_ptr.vmem [resolvable:$true] %s255_s14 }
  0x57   : > { %p1104_p11 = scmp.ne.s32.totalorder %s1438_s13, %s1103_s1  ;;  %s1108_s25 = scalar_lea.hbm %s1606_s2, 512 }
  0x58   : > { %p1109_p3 = scmp.lt.u32.totalorder %s1438_s13, %s1606_s2  ;;  %p1110_p5 = scmp.lt.u32.totalorder %s1108_s25, %s1103_s1 }
  0x59   : > { %p1106_p4 = pnand %p1104_p11, %p1362_p2  ;;  %p1112_p6 = scmp.lt.u32.totalorder %s1103_s1, %s1438_s13 }
  0x5a   : > { %p1111_p7 = por %p1110_p5, %p1109_p3 }
  0x5b   : > { %p1107_p1 = pneg %p1106_p4 }
  0x5c   : > { %p1113_p9 = por %p1112_p6, %p1111_p7 }
  0x5e   : > { %p1114_p12 = pnand %p1113_p9, %p1107_p1 }
  0x60   : > { %1117 = shalt.err (!%p1114_p12)
}
  0x61   : > { %s1118_s8 = scalar_lea.vmem %s1441_s14, 256  ;;  %s1241_s0 = smov [#allocation7]  }
  0x62   : > { %p1119_p0 = scmp.ne.s32.totalorder %s1441_s14, %s1118_s8  ;;  %s1123_s11 = sshll.u32 %s1241_s0, 4  ;;  %s1124_s11 = int_to_ptr.vmem [resolvable:$false] %s1123_s11 }
  0x63   : > { %s1125_s10 = scalar_lea.vmem %s1124_s11, 512  ;;  %p1126_p11 = scmp.lt.s32.totalorder %s1441_s14, %s1124_s11 }
  0x64   : > { %p1121_p8 = pnand %p1119_p0, %p1362_p2  ;;  %p1127_p4 = scmp.lt.s32.totalorder %s1125_s10, %s1118_s8 }
  0x66   : > { %p1122_p10 = pneg %p1121_p8  ;;  %p1128_p3 = por %p1127_p4, %p1126_p11 }
  0x68   : > { %p1129_p5 = pnand %p1128_p3, %p1122_p10 }
  0x6a   : > { %1132 = shalt.err (!%p1129_p5)
}
  0x6b   : > { %986 = dma.hbm_to_vmem [thread:$0]  (!%p1341_p13), %s1438_s13, 256, %s1441_s14, %s1356_s16, %s1631_s17, %s1631_s17, %s1630_s27  }
  0x6c   : > { %p1632_p2 = scmp.ne.s32.totalorder %s1628_s26, 0 }
  0x6d   : > { %s1471_s23 = sand.u32 (!%p1632_p2), 1, %s1227_s19   ;;  %p1633_p1 = scmp.ne.s32.totalorder (!%p1632_p2), %s1620_s28, 0 }
  0x6e   : > { %276 = sbr.rel (%p1632_p2) target bundleno = 884 (0x374), region = 36  ;;  %s1474_s12 = sshll.u32 (!%p1632_p2), %s1471_s23, 4 }
  0x6f   : > { %s279_s9 = scalar_lea.sflag (!%p1632_p2), [#allocation3], %s1471_s23  ;;  %s282_s1 = scalar_lea.vmem (!%p1632_p2), [#allocation2], %s1474_s12 }
  0x75   : > { %1206 = dma.done.wait (%p1633_p1), %s279_s9, 256  }
  0x76   : > { %1208 = vsyncadd (%p1633_p1), %s279_s9, 4294967040  ;;  %s287_s16 = sand.u32 1, %s1300_s22   ;;  %s291_s27 = scalar_lea.vmem [#allocation5], %s1474_s12 }
  0x77   : > { %s288_s26 = scalar_lea.sflag [#allocation6], %s287_s16 }
  0x78   : > { %1210 = dma.done.wait (%p1633_p1), %s288_s26, 512  }
  0x79   : > { %1212 = vsyncadd (%p1633_p1), %s288_s26, 4294966784  ;;  %v1242_v0 = vmov 0.0   ;;  %vm1243_vm0 = vmmov 0   ;;  %vm368_vm1 = vcmask 64512   ;;  %v364_v1 = vld [vmem:[%s291_s27] sm:$0xff]  ;;  %v365_v3 = vld [vmem:[%s291_s27 + $0x8] sm:$0xff] }
  0x7a   : > { %947 = vmatprep.subr.mxu0 %v1242_v0  ;;  %949 = vmatprep.mubr.msk.f32.mxu0 %vm1243_vm0, %v1242_v0  ;;  %v360_v2 = vld [vmem:[%s282_s1] sm:$0xff]  ;;  %v361_v5 = vld [vmem:[%s282_s1 + $0x8] sm:$0xff]  ;;  %s918_s28 = sshll.u32 %s1300_s22, 1  ;;  %v1244_v9 = vmov 0   ;;  %s300_s25 = scalar_lea.vmem [#allocation7], %s1474_s12 }
  0x7b   : > { %952 = vmatprep.subr.mxu1 %v1242_v0  ;;  %954 = vmatprep.mubr.msk.f32.mxu1 %vm1243_vm0, %v1242_v0  ;;  %v362_v4 = vmul.f32 0.35355338, %v360_v2  ;;  %v363_v6 = vmul.f32 0.35355338, %v361_v5  ;;  %p351_p13 = scmp.lt.s32.totalorder %s918_s28, 3  ;;  %v366_v32 = vld [vmem:[%s300_s25] sm:$0xff] }
  0x7c   : > { %948 = vmatpush3.xpose.msk.msra.mxu0 %vm368_vm1, %v364_v1  ;;  %953 = vmatpush3.xpose.msk.msra.mxu1 %vm368_vm1, %v365_v3  ;;  %v367_v33 = vld [vmem:[%s300_s25 + $0x8] sm:$0xff]  ;;  %s346_s15 = scalar_lea.vmem [#allocation9], %s1474_s12  ;;  %s937_s7 = sshll.u32 %s1300_s22, 8 }
  0x7d   : > { %957 = vmatprep.subr.mxu0 %v1242_v0  ;;  %962 = vmatprep.subr.mxu1 %v1242_v0  ;;  %s1643_s28 = smov (!%p351_p13, %s918_s28), 3  ;;  %s740_s8 = sshll.u32 %s346_s15, 4  ;;  %s1518_s8 = int_to_ptr.vmem [resolvable:$true] %s740_s8 }
  0x7e   : > { %s919_s17 = sshll.u32 %s1643_s28, 1  ;;  %s1516_s10 = scalar_lea.hbm %s1609_s5, %s937_s7 }
  0x7f   : > { %950 = vmatmul.mubr.msk.f32.vlgmr.msra.gmra.mrb[0].mxu0 %vm368_vm1, %v362_v4  ;;  %955 = vmatmul.mubr.msk.f32.vlgmr.msra.gmra.mrb[0].mxu1 %vm368_vm1, %v363_v6  ;;  %s354_s6 = scalar_lea.vmem %s1607_s3, %s919_s17  ;;  %s711_s9 = scalar_lea.sflag [#allocation10], %s1471_s23 }
  0x80   : > { %959 = vmatprep.mubr.msk.f32.mxu0 %vm1243_vm0, %v1242_v0  ;;  %964 = vmatprep.mubr.msk.f32.mxu1 %vm1243_vm0, %v1242_v0  ;;  %v521_v7 = vld [vmem:[%s354_s6] sm:$0x3]  ;;  %v522_v8 = vld [vmem:[%s354_s6 + $0x2] sm:$0x3]  ;;  %s1133_s1 = scalar_lea.vmem %s1518_s8, 256  ;;  %p1634_p6 = scmp.ne.s32.totalorder %s1621_s29, 0 }
  0x81   : > { %vm523_vm2 = vnez %v521_v7  ;;  %vm524_vm3 = vnez %v522_v8  ;;  %958 = vmatpush3.msra.mxu0 %v366_v32  ;;  %963 = vmatpush3.msra.mxu1 %v367_v33  ;;  %p1134_p7 = scmp.ne.s32.totalorder %s1518_s8, %s1133_s1  ;;  %s1245_s16 = smov [#allocation9]  }
  0x82   : > { %v525_v10 = vsel %vm523_vm2, 16843009, %v1244_v9  ;;  %v526_v11 = vsel %vm524_vm3, 16843009, %v1244_v9  ;;  %s1137_s26 = sshll.u32 %s1245_s16, 4  ;;  %s1138_s26 = int_to_ptr.vmem [resolvable:$false] %s1137_s26 }
  0x83   : > { %v527_v12 = vunpack.c.0.s8 %v525_v10  ;;  %v528_v13 = vunpack.c.0.s8 %v526_v11  ;;  %p1135_p9 = pnand %p1134_p7, %p1634_p6  ;;  %s1139_s27 = scalar_lea.vmem %s1138_s26, 512 }
  0x84   : > { %p1140_p0 = scmp.lt.s32.totalorder %s1518_s8, %s1138_s26  ;;  %p1141_p8 = scmp.lt.s32.totalorder %s1139_s27, %s1133_s1 }
  0x85   : > { %vm529_vm4 = vcmp.ne.s32.totalorder %v527_v12, 0  ;;  %vm530_vm5 = vcmp.ne.s32.totalorder %v528_v13, 0  ;;  %p1136_p12 = pneg %p1135_p9 }
  0x86   : > { %p1142_p10 = por %p1141_p8, %p1140_p0 }
  0x88   : > { %p1143_p11 = pnand %p1142_p10, %p1136_p12 }
 0x152   : > { %v441_v14 = vpop.f32.mrb[0].mxu0  ;;  %v517_v15 = vpop.f32.mrb[0].mxu1 }
 0x153   : > { %v531_v16 = vsel %vm529_vm4, -1e+09, %v441_v14  ;;  %v951_v17 = vpop.f32.mrb[1].mxu0  ;;  %v532_v18 = vsel %vm530_vm5, -1e+09, %v517_v15  ;;  %v956_v19 = vpop.f32.mrb[1].mxu1 }
 0x154   : > { %v533_v20 = vsel %vm368_vm1, %v531_v16, -inf  ;;  %v536_v21 = vsel %vm368_vm1, %v532_v18, -inf }
 0x155   : > { %534 = vmax.xlane.f32.xlu0 %v533_v20 }
 0x159   : > { %537 = vmax.xlane.f32.xlu0 %v536_v21 }
 0x1e2   : > { %v535_v22 = vpop.xlane.xlu0 %534 }
 0x1e3   : > { %v539_v23 = vsub.f32 %v531_v16, %v535_v22 }
 0x1e5   : > { %v541_v24 = vmul.f32 1.442695, %v539_v23 }
 0x1e6   : > { %v538_v25 = vpop.xlane.xlu0 %537 }
 0x1e7   : > { %1035 = vpow2.f32 %v541_v24  ;;  %v540_v26 = vsub.f32 %v532_v18, %v538_v25 }
 0x1e9   : > { %v543_v27 = vmul.f32 1.442695, %v540_v26 }
 0x1eb   : > { %1037 = vpow2.f32 %v543_v27 }
 0x1f1   : > { %v1036_v28 = vpop.eup %1035 }
 0x1f2   : > { %v545_v29 = vsel %vm368_vm1, %v1036_v28, 0.0 }
 0x1f3   : > { %546 = vadd.xlane.f32.xlu1 %v545_v29 }
 0x1f5   : > { %v1038_v30 = vpop.eup %1037 }
 0x1f6   : > { %v548_v31 = vsel %vm368_vm1, %v1038_v30, 0.0 }
 0x1f7   : > { %549 = vadd.xlane.f32.xlu1 %v548_v31 }
 0x280   : > { %v547_v34 = vpop.xlane.xlu1 %546 }
 0x281   : > { %1039 = vrcp.f32 %v547_v34 }
 0x284   : > { %v550_v35 = vpop.xlane.xlu1 %549 }
 0x285   : > { %1041 = vrcp.f32 %v550_v35 }
 0x28b   : > { %v1040_v36 = vpop.eup %1039 }
 0x28c   : > { %v553_v37 = vmul.f32 %v1040_v36, %v1036_v28 }
 0x28e   : > { %960 = vmatmul.mubr.msk.f32.vlgmr.msra.gmra.mrb[2].mxu0 %vm368_vm1, %v553_v37  ;;  %703 = vst.msk [vmem:[%s346_s15] sm:$0xff] %vm368_vm1, %v553_v37 }
 0x28f   : > { %v1042_v38 = vpop.eup %1041 }
 0x290   : > { %v554_v39 = vmul.f32 %v1042_v38, %v1038_v30 }
 0x292   : > { %965 = vmatmul.mubr.msk.f32.vlgmr.msra.gmra.mrb[2].mxu1 %vm368_vm1, %v554_v39  ;;  %704 = vst.msk [vmem:[%s346_s15 + $0x8] sm:$0xff] %vm368_vm1, %v554_v39 }
 0x293   : > { %1146 = shalt.err (!%p1143_p11)
}
 0x294   : > { %s1147_s28 = scalar_lea.hbm %s1516_s10, 256  ;;  %s1151_s14 = scalar_lea.hbm %s1609_s5, 512 }
 0x295   : > { %p1148_p4 = scmp.ne.s32.totalorder %s1516_s10, %s1147_s28  ;;  %p1152_p2 = scmp.lt.u32.totalorder %s1516_s10, %s1609_s5 }
 0x296   : > { %p1153_p1 = scmp.lt.u32.totalorder %s1151_s14, %s1147_s28  ;;  %p1155_p7 = scmp.lt.u32.totalorder %s1147_s28, %s1516_s10 }
 0x297   : > { %p1149_p3 = pnand %p1148_p4, %p1634_p6 }
 0x298   : > { %p1154_p13 = por %p1153_p1, %p1152_p2 }
 0x299   : > { %p1150_p5 = pneg %p1149_p3 }
 0x29a   : > { %p1156_p9 = por %p1155_p7, %p1154_p13 }
 0x29c   : > { %p1157_p12 = pnand %p1156_p9, %p1150_p5 }
 0x29e   : > { %1160 = shalt.err (!%p1157_p12)
}
 0x29f   : > { %s1246_s15 = smov 128   ;;  %s1247_s0 = smov 8  }
 0x2a0   : > { %974 = dma.vmem_to_hbm [thread:$0]  (%p1634_p6), %s1518_s8, 256, %s1516_s10, %s711_s9, %s1246_s15, %s1246_s15, %s1247_s0  }
 0x2a1   : > { %s339_s11 = scalar_lea.vmem [#allocation8], %s1474_s12  ;;  %s1556_s27 = scalar_lea.hbm %s1608_s4, %s937_s7 }
 0x2a2   : > { %s724_s1 = sshll.u32 %s339_s11, 4  ;;  %s706_s12 = scalar_lea.sflag [#allocation4], %s1471_s23  ;;  %s1549_s1 = int_to_ptr.vmem [resolvable:$true] %s724_s1 }
 0x2a3   : > { %s1161_s8 = scalar_lea.vmem %s1549_s1, 256  ;;  %s1248_s10 = smov [#allocation8]  }
 0x2a4   : > { %p1162_p0 = scmp.ne.s32.totalorder %s1549_s1, %s1161_s8  ;;  %s1165_s22 = sshll.u32 %s1248_s10, 4  ;;  %s1166_s22 = int_to_ptr.vmem [resolvable:$false] %s1165_s22 }
 0x2a5   : > { %s1167_s9 = scalar_lea.vmem %s1166_s22, 512  ;;  %p1168_p11 = scmp.lt.s32.totalorder %s1549_s1, %s1166_s22 }
 0x2a6   : > { %p1163_p8 = pnand %p1162_p0, %p1634_p6  ;;  %p1169_p4 = scmp.lt.s32.totalorder %s1167_s9, %s1161_s8 }
 0x2a8   : > { %p1164_p10 = pneg %p1163_p8  ;;  %p1170_p3 = por %p1169_p4, %p1168_p11 }
 0x2aa   : > { %p1171_p5 = pnand %p1170_p3, %p1164_p10 }
 0x361   : > { %v624_v40 = vpop.f32.mrb[2].mxu0 }
 0x362   : > { %701 = vst.msk [vmem:[%s339_s11] sm:$0xff] %vm368_vm1, %v624_v40  ;;  %v961_v41 = vpop.f32.mrb[3].mxu0 }
 0x365   : > { %v697_v42 = vpop.f32.mrb[2].mxu1 }
 0x366   : > { %702 = vst.msk [vmem:[%s339_s11 + $0x8] sm:$0xff] %vm368_vm1, %v697_v42  ;;  %v966_v43 = vpop.f32.mrb[3].mxu1 }
 0x367   : > { %1174 = shalt.err (!%p1171_p5)
}
 0x368   : > { %s1175_s7 = scalar_lea.hbm %s1556_s27, 256  ;;  %s1179_s13 = scalar_lea.hbm %s1608_s4, 512 }
 0x369   : > { %p1176_p2 = scmp.ne.s32.totalorder %s1556_s27, %s1175_s7  ;;  %p1180_p7 = scmp.lt.u32.totalorder %s1556_s27, %s1608_s4 }
 0x36a   : > { %p1181_p9 = scmp.lt.u32.totalorder %s1179_s13, %s1175_s7  ;;  %p1183_p0 = scmp.lt.u32.totalorder %s1175_s7, %s1556_s27 }
 0x36b   : > { %p1177_p1 = pnand %p1176_p2, %p1634_p6 }
 0x36c   : > { %p1182_p12 = por %p1181_p9, %p1180_p7 }
 0x36d   : > { %p1178_p13 = pneg %p1177_p1 }
 0x36e   : > { %p1184_p8 = por %p1183_p0, %p1182_p12 }
 0x370   : > { %p1185_p10 = pnand %p1184_p8, %p1178_p13 }
 0x372   : > { %1188 = shalt.err (!%p1185_p10)
}
 0x373   : > { %973 = dma.vmem_to_hbm [thread:$0]  (%p1634_p6), %s1549_s1, 256, %s1556_s27, %s706_s12, %s1246_s15, %s1246_s15, %s1247_s0  }
 0x374 PF: > { %s755_s25 = sand.u32 1, %s1223_s18   ;;  %p1635_p11 = scmp.ne.s32.totalorder %s1622_s30, 0 }
 0x375   : > { %p1636_p4 = scmp.ge.s32.totalorder %s1235_s21, 2  ;;  %s756_s11 = scalar_lea.sflag [#allocation4], %s755_s25 }
 0x377   : > { %p988_p3 = pnand %p1636_p4, %p1635_p11 }
 0x379   : > { %1214 = dma.done.wait (!%p988_p3), %s756_s11, 256  }
 0x37a   : > { %1216 = vsyncadd (!%p988_p3), %s756_s11, 4294967040  ;;  %s765_s29 = scalar_lea.sflag [#allocation10], %s755_s25 }
 0x37b   : > { %1218 = dma.done.wait (!%p988_p3), %s765_s29, 256  }
 0x37c   : > { %1220 = vsyncadd (!%p988_p3), %s765_s29, 4294967040  ;;  %s1637_s23 = sld [smem:[#allocation15_spill]]  ;;  %p25_p6 = scmp.ge.s32.totalorder %s1304_s24, 4  }
 0x37d   : > { %s1638_s18 = smov %s1227_s19  ;;  %s1639_s19 = smov %s1231_s20 }
 0x37e   : > { %s1641_s21 = smov %s1304_s24  ;;  %27 = sbr.rel (!%p25_p6) target bundleno = 12 (0xc), region = 125 }
 0x382   : > { %s1640_s20 = smov %s1637_s23 }
 0x385   :  { %770 = vsyncpa [#allocation3], 1 }
 0x386   :  { %772 = vsyncpa [#allocation3 + $0x1], 1 }
 0x387   :  { %773 = vsyncpa [#allocation6], 1 }
 0x388   :  { %775 = vsyncpa [#allocation6 + $0x1], 1 }
 0x389   :  { %776 = vsyncpa [#allocation4], 1 }
 0x38a   :  { %778 = vsyncpa [#allocation4 + $0x1], 1 }
 0x38b   :  { %779 = vsyncpa [#allocation10], 1 }
 0x38c   :  { %781 = vsyncpa [#allocation10 + $0x1], 1 }

</bundles_post_ra>
